<compile_context>
chip_gen: v6e
topology: v6e:2x2x1
jax: 0.10.0
libtpu: 0.0.40
codegen_flags: <defaults>
</compile_context>

<pallas_src>
import functools

import jax
import jax.numpy as jnp
from jax.experimental import pallas as pl
from jax.experimental.pallas import tpu as pltpu

HIDDEN = 200      # logical hidden width (nn.Linear(input, 200))
_LANE = 128       # TPU lane width -> hidden dim padded to a multiple of this


def _round_up(n, m):
    return ((n + m - 1) // m) * m


# ---------------------------------------------------------------------------
# Fused kernel: relu(x@W1+b1) -> relu(.@W2+b2) -> .@W3+b3, all in VMEM/vregs.
# ---------------------------------------------------------------------------
def _fused_mlp_kernel(x_ref, w1_ref, b1_ref, w2_ref, b2_ref, w3_ref, b3_ref,
                      o_ref):
    h = jnp.dot(x_ref[...], w1_ref[...],
                preferred_element_type=jnp.float32) + b1_ref[...]
    h = jnp.maximum(h, 0.0)
    # TODO(synk): nn.Dropout with the default dropout_p=0 (and in eval mode) is
    # the identity, so it is omitted; a p>0 training-mode dropout would use
    # pltpu.prng_seed + pltpu.stateful_bernoulli here.
    h = jnp.dot(h, w2_ref[...],
                preferred_element_type=jnp.float32) + b2_ref[...]
    h = jnp.maximum(h, 0.0)
    o_ref[...] = (jnp.dot(h, w3_ref[...],
                          preferred_element_type=jnp.float32)
                  + b3_ref[...]).astype(o_ref.dtype)


# ---------------------------------------------------------------------------
# Parameter setup (matches nn.Linear's U(-1/sqrt(fan_in), 1/sqrt(fan_in)) init,
# weights stored as [in, out]).
# ---------------------------------------------------------------------------
def init_mlp_params(key, input_size, output_size):
    dims = [(input_size, HIDDEN), (HIDDEN, HIDDEN), (HIDDEN, output_size)]
    params = []
    for fi, fo in dims:
        key, kw, kb = jax.random.split(key, 3)
        bound = 1.0 / float(fi) ** 0.5
        params.append({
            "W": jax.random.uniform(kw, (fi, fo), jnp.float32, -bound, bound),
            "b": jax.random.uniform(kb, (fo,), jnp.float32, -bound, bound),
        })
    return params


def pad_mlp_params(params):
    """Zero-pad ONLY the hidden (200 -> 256) dims; done once outside forward.

    Input-feature and output-feature dims stay at their logical sizes: as
    whole-array VMEM blocks they bypass the (8,128) rule and Mosaic pads them
    in-register, so HBM-side zero padding there is pure wasted DMA.
    Hidden padding is exact: zero weight columns get zero bias ->
    relu(0) = 0 -> those rows contribute nothing to the next layer.
    """
    in_f = params[0]["W"].shape[0]
    out_f = params[2]["W"].shape[1]
    h_p = _round_up(HIDDEN, _LANE)   # 200 -> 256

    def _pad(p, fi_p, fo_p):
        fi, fo = p["W"].shape
        w = jnp.zeros((fi_p, fo_p), jnp.float32).at[:fi, :fo].set(p["W"])
        b = jnp.zeros((1, fo_p), jnp.float32).at[0, :fo].set(p["b"])
        return {"W": w, "b": b}

    return [
        _pad(params[0], in_f, h_p),   # (in, 256)
        _pad(params[1], h_p, h_p),    # (256, 256)
        _pad(params[2], h_p, out_f),  # (256, out)
    ]


# ---------------------------------------------------------------------------
# Forward wrapper: single fused kernel, no host-side pad/slice dispatches.
# ---------------------------------------------------------------------------
@jax.jit
def mlp_forward(x, padded_params):
    batch = x.shape[0]
    k1 = padded_params[0]["W"].shape[0]
    hid = padded_params[0]["W"].shape[1]
    out_f = padded_params[2]["W"].shape[1]

    operands = (x,
                padded_params[0]["W"], padded_params[0]["b"],
                padded_params[1]["W"], padded_params[1]["b"],
                padded_params[2]["W"], padded_params[2]["b"])

    flops = 2 * batch * (k1 * hid + hid * hid + hid * out_f)
    bytes_accessed = (sum(int(a.size) * a.dtype.itemsize for a in operands)
                      + batch * out_f * 4)

    vmem = pl.BlockSpec(memory_space=pltpu.MemorySpace.VMEM)
    return pl.pallas_call(
        _fused_mlp_kernel,
        out_shape=jax.ShapeDtypeStruct((batch, out_f), jnp.float32),
        in_specs=[vmem] * 7,
        out_specs=vmem,
        cost_estimate=pl.CostEstimate(flops=flops,
                                      transcendentals=0,
                                      bytes_accessed=bytes_accessed),
    )(*operands)


# ---------------------------------------------------------------------------
# Pure-JAX reference for correctness checking.
# ---------------------------------------------------------------------------
def reference_forward(x, params):
    h = jnp.maximum(
        jnp.dot(x, params[0]["W"], precision="highest") + params[0]["b"], 0.0)
    h = jnp.maximum(
        jnp.dot(h, params[1]["W"], precision="highest") + params[1]["b"], 0.0)
    return jnp.dot(h, params[2]["W"], precision="highest") + params[2]["b"]


if __name__ == "__main__":
    input_size = 32
    output_size = 16
    batch = 8

    root = jax.random.PRNGKey(0)
    kx, kp = jax.random.split(root)

    x = jax.random.normal(kx, (batch, input_size), jnp.float32)
    params = init_mlp_params(kp, input_size, output_size)
    padded_params = pad_mlp_params(params)   # one-time padding, reused per call

    out = jax.block_until_ready(mlp_forward(x, padded_params))

    ref = reference_forward(x, params)
    assert out.shape == (batch, output_size)
    assert jnp.allclose(out, ref, atol=1e-3, rtol=1e-3), (
        float(jnp.max(jnp.abs(out - ref))))

    print("KERNEL_OK")
</pallas_src>

<mosaic_0001>
module attributes {stable_mosaic.version = 11 : i64} {
  func.func @_fused_mlp_kernel(%arg0: memref<8x32xf32, #tpu.memory_space<vmem>>, %arg1: memref<32x256xf32, #tpu.memory_space<vmem>>, %arg2: memref<1x256xf32, #tpu.memory_space<vmem>>, %arg3: memref<256x256xf32, #tpu.memory_space<vmem>>, %arg4: memref<1x256xf32, #tpu.memory_space<vmem>>, %arg5: memref<256x16xf32, #tpu.memory_space<vmem>>, %arg6: memref<1x16xf32, #tpu.memory_space<vmem>>, %arg7: memref<8x16xf32, #tpu.memory_space<vmem>>) attributes {dimension_semantics = [], scalar_prefetch = 0 : i64, scratch_operands = 0 : i64, tpu.core_type = #tpu.core_type<tc>} {
    %c0 = arith.constant 0 : index
    %c0_0 = arith.constant 0 : index
    %0 = vector.load %arg0[%c0, %c0_0] : memref<8x32xf32, #tpu.memory_space<vmem>>, vector<8x32xf32>
    %c0_1 = arith.constant 0 : index
    %c0_2 = arith.constant 0 : index
    %1 = vector.load %arg1[%c0_1, %c0_2] : memref<32x256xf32, #tpu.memory_space<vmem>>, vector<32x256xf32>
    %cst = arith.constant dense<0.000000e+00> : vector<8x256xf32>
    %2 = tpu.matmul %0, %1, %cst {dimension_numbers = #tpu.dot_dimension_numbers<[1], [0], [0], [1], [0, 0, 1, 1], [], []>} : vector<8x32xf32>, vector<32x256xf32>, vector<8x256xf32> -> vector<8x256xf32>
    %c0_3 = arith.constant 0 : index
    %c0_4 = arith.constant 0 : index
    %3 = vector.load %arg2[%c0_3, %c0_4] : memref<1x256xf32, #tpu.memory_space<vmem>>, vector<1x256xf32>
    %4 = vector.broadcast %3 : vector<1x256xf32> to vector<8x256xf32>
    %5 = arith.addf %2, %4 : vector<8x256xf32>
    %cst_5 = arith.constant 0.000000e+00 : f32
    %6 = vector.broadcast %cst_5 : f32 to vector<8x256xf32>
    %7 = arith.maximumf %5, %6 : vector<8x256xf32>
    %c0_6 = arith.constant 0 : index
    %c0_7 = arith.constant 0 : index
    %8 = vector.load %arg3[%c0_6, %c0_7] : memref<256x256xf32, #tpu.memory_space<vmem>>, vector<256x256xf32>
    %cst_8 = arith.constant dense<0.000000e+00> : vector<8x256xf32>
    %9 = tpu.matmul %7, %8, %cst_8 {dimension_numbers = #tpu.dot_dimension_numbers<[1], [0], [0], [1], [0, 0, 1, 1], [], []>} : vector<8x256xf32>, vector<256x256xf32>, vector<8x256xf32> -> vector<8x256xf32>
    %c0_9 = arith.constant 0 : index
    %c0_10 = arith.constant 0 : index
    %10 = vector.load %arg4[%c0_9, %c0_10] : memref<1x256xf32, #tpu.memory_space<vmem>>, vector<1x256xf32>
    %11 = vector.broadcast %10 : vector<1x256xf32> to vector<8x256xf32>
    %12 = arith.addf %9, %11 : vector<8x256xf32>
    %cst_11 = arith.constant 0.000000e+00 : f32
    %13 = vector.broadcast %cst_11 : f32 to vector<8x256xf32>
    %14 = arith.maximumf %12, %13 : vector<8x256xf32>
    %c0_12 = arith.constant 0 : index
    %c0_13 = arith.constant 0 : index
    %15 = vector.load %arg5[%c0_12, %c0_13] : memref<256x16xf32, #tpu.memory_space<vmem>>, vector<256x16xf32>
    %cst_14 = arith.constant dense<0.000000e+00> : vector<8x16xf32>
    %16 = tpu.matmul %14, %15, %cst_14 {dimension_numbers = #tpu.dot_dimension_numbers<[1], [0], [0], [1], [0, 0, 1, 1], [], []>} : vector<8x256xf32>, vector<256x16xf32>, vector<8x16xf32> -> vector<8x16xf32>
    %c0_15 = arith.constant 0 : index
    %c0_16 = arith.constant 0 : index
    %17 = vector.load %arg6[%c0_15, %c0_16] : memref<1x16xf32, #tpu.memory_space<vmem>>, vector<1x16xf32>
    %18 = vector.broadcast %17 : vector<1x16xf32> to vector<8x16xf32>
    %19 = arith.addf %16, %18 : vector<8x16xf32>
    %c0_17 = arith.constant 0 : index
    %c0_18 = arith.constant 0 : index
    %20 = vector.load %arg7[%c0_17, %c0_18] : memref<8x16xf32, #tpu.memory_space<vmem>>, vector<8x16xf32>
    tpu.vector_store %arg7[%c0_17, %c0_18], %19 {strides = array<i32>} : memref<8x16xf32, #tpu.memory_space<vmem>>, vector<8x16xf32>,
    return
  }
}

</mosaic_0001>

<bundles_post_ra>
// kernel: mlp_forward.1
= control target key start
LH: loop header
LB: loop body
LE: loop exit
PB: predicated region body
PF: predicated region fallthrough
CT: control target
= control target key end

     0   :  { %12 = vsyncpa [#allocation3], 0  ;;  %s683_s0 = inlined_call_operand.vmem [shape: f32[8,32], index: 0, kind: input, shape index: {}]   ;;  %s684_s1 = inlined_call_operand.vmem [shape: f32[32,256], index: 1, kind: input, shape index: {}]   ;;  %s685_s2 = inlined_call_operand.vmem [shape: f32[1,256], index: 2, kind: input, shape index: {}]   ;;  %s686_s3 = inlined_call_operand.hbm [shape: f32[256,256], index: 3, kind: input, shape index: {}]   ;;  %s687_s4 = inlined_call_operand.vmem [shape: f32[1,256], index: 4, kind: input, shape index: {}]   ;;  %s688_s5 = inlined_call_operand.vmem [shape: f32[256,16], index: 5, kind: input, shape index: {}]   ;;  %s689_s6 = inlined_call_operand.vmem [shape: f32[1,16], index: 6, kind: input, shape index: {}]   ;;  %s690_s7 = inlined_call_operand.hbm [shape: f32[8,16], index: 7, kind: output, shape index: {}]  }
   0x1   :  { %13 = vsyncpa [#allocation4], 0  ;;  %s500_s24 = smov [#allocation2]  }
   0x2   :  { %s25_s25 = sshll.u32 %s500_s24, 4  ;;  %s26_s25 = int_to_ptr.vmem [resolvable:$true] %s25_s25 }
   0x3   :  { %s464_s26 = scalar_lea.vmem %s26_s25, 8192  ;;  %p469_p1 = scmp.lt.s32.totalorder %s26_s25, %s26_s25 }
   0x4   :  { %p465_p0 = scmp.ne.s32.totalorder %s26_s25, %s464_s26  ;;  %p470_p2 = scmp.lt.s32.totalorder %s464_s26, %s464_s26 }
   0x6   :  { %p471_p3 = por %p470_p2, %p469_p1 }
   0x8   :  { %p472_p4 = pnand %p471_p3, %p465_p0 }
   0xa   :  { %475 = shalt.err (!%p472_p4)
}
   0xb   :  { %s501_s27 = smov 256   ;;  %s502_s28 = smov 16  }
   0xc   :  { %31 = dma.hbm_to_vmem [thread:$0]  %s686_s3, 8192, %s26_s25, [#allocation3], %s501_s27, %s501_s27, %s502_s28  }
   0xd   :  { %496 = dma.done.wait [#allocation3], 8192  }
   0xe   :  { %497 = vsyncadd [#allocation3], 4294959104  ;;  %v503_v0 = vmov 0.0   ;;  %v49_v1 = vld [vmem:[%s684_s1 + $0x38] sm:$0xff]  ;;  %v48_v2 = vld [vmem:[%s684_s1 + $0x30] sm:$0xff]  ;;  %vm62_vm0 = vcmask 261120  }
   0xf   :  { %130 = vmatprep.mubr.f32.mxu0 %v503_v0  ;;  %v47_v3 = vld [vmem:[%s684_s1 + $0x28] sm:$0xff]  ;;  %90 = vmatprep.subr.mxu0 %v49_v1  ;;  %v46_v4 = vld [vmem:[%s684_s1 + $0x20] sm:$0xff]  ;;  %v45_v5 = vld [vmem:[%s684_s1 + $0x18] sm:$0xff]  ;;  %vm397_vm1 = vcmask 130048  }
  0x10   :  { %91 = vmatpush1.msra.mxu0 %v48_v2  ;;  %v44_v6 = vld [vmem:[%s684_s1 + $0x10] sm:$0xff]  ;;  %v170_v7 = vld [vmem:[#allocation2 + $0xf8] sm:$0xff]  ;;  %v168_v9 = vld [vmem:[#allocation2 + $0xe8] sm:$0xff] }
  0x11   :  { %92 = vmatprep.subr.mxu0 %v47_v3  ;;  %v169_v8 = vld [vmem:[#allocation2 + $0xf0] sm:$0xff]  ;;  %v43_v10 = vld [vmem:[%s684_s1 + $0x8] sm:$0xff]  ;;  %215 = vmatprep.subr.mxu1 %v170_v7  ;;  %v167_v11 = vld [vmem:[#allocation2 + $0xe0] sm:$0xff] }
  0x12   :  { %93 = vmatpush1.msra.mxu0 %v46_v4  ;;  %v42_v12 = vld [vmem:[%s684_s1] sm:$0xff]  ;;  %216 = vmatpush1.msra.mxu1 %v169_v8  ;;  %v166_v13 = vld [vmem:[#allocation2 + $0xd8] sm:$0xff]  ;;  %v165_v15 = vld [vmem:[#allocation2 + $0xd0] sm:$0xff] }
  0x13   :  { %94 = vmatprep.subr.mxu0 %v45_v5  ;;  %v41_v14 = vld [vmem:[%s683_s0] sm:$0xff]  ;;  %217 = vmatprep.subr.mxu1 %v168_v9  ;;  %v164_v16 = vld [vmem:[#allocation2 + $0xc8] sm:$0xff]  ;;  %v162_v18 = vld [vmem:[#allocation2 + $0xb8] sm:$0xff] }
  0x14   :  { %95 = vmatpush1.msra.mxu0 %v44_v6  ;;  %218 = vmatpush1.msra.mxu1 %v167_v11  ;;  %v163_v17 = vld [vmem:[#allocation2 + $0xc0] sm:$0xff]  ;;  %v161_v19 = vld [vmem:[#allocation2 + $0xb0] sm:$0xff]  ;;  %v160_v20 = vld [vmem:[#allocation2 + $0xa8] sm:$0xff] }
  0x15   :  { %96 = vmatprep.subr.mxu0 %v43_v10  ;;  %219 = vmatprep.subr.mxu1 %v166_v13  ;;  %v159_v21 = vld [vmem:[#allocation2 + $0xa0] sm:$0xff]  ;;  %v158_v22 = vld [vmem:[#allocation2 + $0x98] sm:$0xff]  ;;  %v157_v23 = vld [vmem:[#allocation2 + $0x90] sm:$0xff] }
  0x16   :  { %97 = vmatpush1.msra.mxu0 %v42_v12  ;;  %220 = vmatpush1.msra.mxu1 %v165_v15  ;;  %v156_v24 = vld [vmem:[#allocation2 + $0x88] sm:$0xff]  ;;  %v155_v25 = vld [vmem:[#allocation2 + $0x80] sm:$0xff]  ;;  %v154_v26 = vld [vmem:[#allocation2 + $0x78] sm:$0xff] }
  0x17   :  { %414 = vmatmul.mubr.msk.f32.vlgmr.msra.gmra.mxu0 %vm62_vm0, %v41_v14  ;;  %221 = vmatprep.subr.mxu1 %v164_v16  ;;  %v153_v27 = vld [vmem:[#allocation2 + $0x70] sm:$0xff]  ;;  %v152_v28 = vld [vmem:[#allocation2 + $0x68] sm:$0xff]  ;;  %v151_v29 = vld [vmem:[#allocation2 + $0x60] sm:$0xff] }
  0x18   :  { %222 = vmatpush1.msra.mxu1 %v163_v17  ;;  %v150_v30 = vld [vmem:[#allocation2 + $0x58] sm:$0xff]  ;;  %v149_v31 = vld [vmem:[#allocation2 + $0x50] sm:$0xff]  ;;  %v148_v32 = vld [vmem:[#allocation2 + $0x48] sm:$0xff] }
  0x19   :  { %223 = vmatprep.subr.mxu1 %v162_v18  ;;  %v147_v33 = vld [vmem:[#allocation2 + $0x40] sm:$0xff]  ;;  %v146_v34 = vld [vmem:[#allocation2 + $0x38] sm:$0xff]  ;;  %v145_v35 = vld [vmem:[#allocation2 + $0x30] sm:$0xff] }
  0x1a   :  { %224 = vmatpush1.msra.mxu1 %v161_v19  ;;  %v144_v36 = vld [vmem:[#allocation2 + $0x28] sm:$0xff]  ;;  %v143_v37 = vld [vmem:[#allocation2 + $0x20] sm:$0xff]  ;;  %v142_v38 = vld [vmem:[#allocation2 + $0x18] sm:$0xff] }
  0x1b   :  { %225 = vmatprep.subr.mxu1 %v160_v20  ;;  %v141_v39 = vld [vmem:[#allocation2 + $0x10] sm:$0xff]  ;;  %v140_v40 = vld [vmem:[#allocation2 + $0x8] sm:$0xff]  ;;  %v139_v41 = vld [vmem:[#allocation2] sm:$0xff] }
  0x1c   :  { %226 = vmatpush1.msra.mxu1 %v159_v21  ;;  %v202_v42 = vld [vmem:[#allocation2 + $0x1f8] sm:$0xff]  ;;  %v201_v43 = vld [vmem:[#allocation2 + $0x1f0] sm:$0xff]  ;;  %v200_v44 = vld [vmem:[#allocation2 + $0x1e8] sm:$0xff] }
  0x1d   :  { %227 = vmatprep.subr.mxu1 %v158_v22  ;;  %v199_v45 = vld [vmem:[#allocation2 + $0x1e0] sm:$0xff]  ;;  %v198_v46 = vld [vmem:[#allocation2 + $0x1d8] sm:$0xff]  ;;  %v197_v47 = vld [vmem:[#allocation2 + $0x1d0] sm:$0xff] }
  0x1e   :  { %228 = vmatpush1.msra.mxu1 %v157_v23  ;;  %v196_v48 = vld [vmem:[#allocation2 + $0x1c8] sm:$0xff]  ;;  %v195_v49 = vld [vmem:[#allocation2 + $0x1c0] sm:$0xff]  ;;  %v194_v50 = vld [vmem:[#allocation2 + $0x1b8] sm:$0xff] }
  0x1f   :  { %229 = vmatprep.subr.mxu1 %v156_v24  ;;  %v193_v51 = vld [vmem:[#allocation2 + $0x1b0] sm:$0xff]  ;;  %v192_v52 = vld [vmem:[#allocation2 + $0x1a8] sm:$0xff]  ;;  %v191_v53 = vld [vmem:[#allocation2 + $0x1a0] sm:$0xff] }
  0x20   :  { %230 = vmatpush1.msra.mxu1 %v155_v25  ;;  %v190_v54 = vld [vmem:[#allocation2 + $0x198] sm:$0xff]  ;;  %v189_v55 = vld [vmem:[#allocation2 + $0x190] sm:$0xff]  ;;  %v188_v56 = vld [vmem:[#allocation2 + $0x188] sm:$0xff] }
  0x21   :  { %231 = vmatprep.subr.mxu1 %v154_v26  ;;  %v187_v57 = vld [vmem:[#allocation2 + $0x180] sm:$0xff]  ;;  %v186_v58 = vld [vmem:[#allocation2 + $0x178] sm:$0xff]  ;;  %v185_v59 = vld [vmem:[#allocation2 + $0x170] sm:$0xff] }
  0x22   :  { %232 = vmatpush1.msra.mxu1 %v153_v27  ;;  %v184_v60 = vld [vmem:[#allocation2 + $0x168] sm:$0xff]  ;;  %v183_v61 = vld [vmem:[#allocation2 + $0x160] sm:$0xff]  ;;  %v182_v62 = vld [vmem:[#allocation2 + $0x158] sm:$0xff] }
  0x23   :  { %233 = vmatprep.subr.mxu1 %v152_v28  ;;  %v181_v63 = vld [vmem:[#allocation2 + $0x150] sm:$0xff]  ;;  %v180_v0 = vld [vmem:[#allocation2 + $0x148] sm:$0xff]  ;;  %v179_v1 = vld [vmem:[#allocation2 + $0x140] sm:$0xff] }
  0x24   :  { %234 = vmatpush1.msra.mxu1 %v151_v29  ;;  %v178_v2 = vld [vmem:[#allocation2 + $0x138] sm:$0xff]  ;;  %v177_v3 = vld [vmem:[#allocation2 + $0x130] sm:$0xff]  ;;  %v176_v4 = vld [vmem:[#allocation2 + $0x128] sm:$0xff] }
  0x25   :  { %235 = vmatprep.subr.mxu1 %v150_v30  ;;  %v175_v5 = vld [vmem:[#allocation2 + $0x120] sm:$0xff]  ;;  %v174_v6 = vld [vmem:[#allocation2 + $0x118] sm:$0xff]  ;;  %v173_v7 = vld [vmem:[#allocation2 + $0x110] sm:$0xff] }
  0x26   :  { %236 = vmatpush1.msra.mxu1 %v149_v31  ;;  %v172_v8 = vld [vmem:[#allocation2 + $0x108] sm:$0xff]  ;;  %v171_v9 = vld [vmem:[#allocation2 + $0x100] sm:$0xff]  ;;  %v319_v10 = vld [vmem:[%s688_s5 + $0xf8] sm:$0xff] }
  0x27   :  { %237 = vmatprep.subr.mxu1 %v148_v32  ;;  %v303_v11 = vld [vmem:[%s688_s5 + $0x78] sm:$0xff]  ;;  %v318_v12 = vld [vmem:[%s688_s5 + $0xf0] sm:$0xff]  ;;  %416 = vmatprep.subr.mxu0 %v319_v10  ;;  %v317_v14 = vld [vmem:[%s688_s5 + $0xe8] sm:$0xff] }
  0x28   :  { %238 = vmatpush1.msra.mxu1 %v147_v33  ;;  %v302_v13 = vld [vmem:[%s688_s5 + $0x70] sm:$0xff]  ;;  %417 = vmatpush3.msra.mxu0 %v303_v11  ;;  %v301_v15 = vld [vmem:[%s688_s5 + $0x68] sm:$0xff]  ;;  %v316_v16 = vld [vmem:[%s688_s5 + $0xe0] sm:$0xff] }
  0x29   :  { %239 = vmatprep.subr.mxu1 %v146_v34  ;;  %418 = vmatprep.subr.mxu0 %v318_v12  ;;  %v300_v17 = vld [vmem:[%s688_s5 + $0x60] sm:$0xff]  ;;  %v315_v18 = vld [vmem:[%s688_s5 + $0xd8] sm:$0xff]  ;;  %v314_v20 = vld [vmem:[%s688_s5 + $0xd0] sm:$0xff]  ;;  %v52_v34 = vlaneseq }
  0x2a   :  { %240 = vmatpush1.msra.mxu1 %v145_v35  ;;  %419 = vmatpush3.msra.mxu0 %v302_v13  ;;  %v299_v19 = vld [vmem:[%s688_s5 + $0x58] sm:$0xff]  ;;  %v298_v21 = vld [vmem:[%s688_s5 + $0x50] sm:$0xff]  ;;  %v313_v22 = vld [vmem:[%s688_s5 + $0xc8] sm:$0xff] }
  0x2b   :  { %241 = vmatprep.subr.mxu1 %v144_v36  ;;  %420 = vmatprep.subr.mxu0 %v317_v14  ;;  %v297_v23 = vld [vmem:[%s688_s5 + $0x48] sm:$0xff]  ;;  %v312_v24 = vld [vmem:[%s688_s5 + $0xc0] sm:$0xff]  ;;  %v311_v26 = vld [vmem:[%s688_s5 + $0xb8] sm:$0xff]  ;;  %v53_v35 = vshrl.u32 %v52_v34, 7 }
  0x2c   :  { %242 = vmatpush1.msra.mxu1 %v143_v37  ;;  %421 = vmatpush3.msra.mxu0 %v301_v15  ;;  %v296_v25 = vld [vmem:[%s688_s5 + $0x40] sm:$0xff]  ;;  %v295_v27 = vld [vmem:[%s688_s5 + $0x38] sm:$0xff]  ;;  %v310_v28 = vld [vmem:[%s688_s5 + $0xb0] sm:$0xff] }
  0x2d   :  { %243 = vmatprep.subr.mxu1 %v142_v38  ;;  %422 = vmatprep.subr.mxu0 %v316_v16  ;;  %v294_v29 = vld [vmem:[%s688_s5 + $0x30] sm:$0xff]  ;;  %v309_v30 = vld [vmem:[%s688_s5 + $0xa8] sm:$0xff]  ;;  %v308_v32 = vld [vmem:[%s688_s5 + $0xa0] sm:$0xff]  ;;  %v54_v36 = vsub.s32 0, %v53_v35  ;;  %v58_v38 = vsub.s32 1, %v53_v35 }
  0x2e   :  { %244 = vmatpush1.msra.mxu1 %v141_v39  ;;  %423 = vmatpush3.msra.mxu0 %v300_v17  ;;  %v293_v31 = vld [vmem:[%s688_s5 + $0x28] sm:$0xff]  ;;  %v292_v33 = vld [vmem:[%s688_s5 + $0x20] sm:$0xff] }
  0x2f   :  { %245 = vmatprep.subr.mxu1 %v140_v40  ;;  %424 = vmatprep.subr.mxu0 %v315_v18  ;;  %v50_v37 = vld [vmem:[%s685_s2] sm:$0x3] }
  0x30   :  { %246 = vmatpush1.msra.mxu1 %v139_v41  ;;  %425 = vmatpush3.msra.mxu0 %v299_v19  ;;  %v55_v39 = vrot.slane %v50_v37, %v54_v36  ;;  %v59_v40 = vrot.slane %v50_v37, %v58_v38 }
  0x31   :  { %247 = vmatprep.subr.mxu1 %v202_v42  ;;  %426 = vmatprep.subr.mxu0 %v314_v20 }
  0x32   :  { %248 = vmatpush2.msra.mxu1 %v201_v43  ;;  %427 = vmatpush3.msra.mxu0 %v298_v21 }
  0x33   :  { %249 = vmatprep.subr.mxu1 %v200_v44  ;;  %428 = vmatprep.subr.mxu0 %v313_v22 }
  0x34   :  { %250 = vmatpush2.msra.mxu1 %v199_v45  ;;  %429 = vmatpush3.msra.mxu0 %v297_v23 }
  0x35   :  { %251 = vmatprep.subr.mxu1 %v198_v46  ;;  %430 = vmatprep.subr.mxu0 %v312_v24 }
  0x36   :  { %252 = vmatpush2.msra.mxu1 %v197_v47  ;;  %431 = vmatpush3.msra.mxu0 %v296_v25  ;;  %v307_v47 = vld [vmem:[%s688_s5 + $0x98] sm:$0xff] }
  0x37   :  { %253 = vmatprep.subr.mxu1 %v196_v48  ;;  %432 = vmatprep.subr.mxu0 %v311_v26  ;;  %v291_v48 = vld [vmem:[%s688_s5 + $0x18] sm:$0xff] }
  0x38   :  { %254 = vmatpush2.msra.mxu1 %v195_v49  ;;  %433 = vmatpush3.msra.mxu0 %v295_v27  ;;  %v306_v49 = vld [vmem:[%s688_s5 + $0x90] sm:$0xff] }
  0x39   :  { %255 = vmatprep.subr.mxu1 %v194_v50  ;;  %434 = vmatprep.subr.mxu0 %v310_v28  ;;  %v290_v50 = vld [vmem:[%s688_s5 + $0x10] sm:$0xff] }
  0x3a   :  { %256 = vmatpush2.msra.mxu1 %v193_v51  ;;  %435 = vmatpush3.msra.mxu0 %v294_v29  ;;  %v305_v51 = vld [vmem:[%s688_s5 + $0x88] sm:$0xff] }
  0x3b   :  { %257 = vmatprep.subr.mxu1 %v192_v52  ;;  %436 = vmatprep.subr.mxu0 %v309_v30  ;;  %v289_v52 = vld [vmem:[%s688_s5 + $0x8] sm:$0xff] }
  0x3c   :  { %258 = vmatpush2.msra.mxu1 %v191_v53  ;;  %437 = vmatpush3.msra.mxu0 %v293_v31  ;;  %v304_v53 = vld [vmem:[%s688_s5 + $0x80] sm:$0xff] }
  0x3d   :  { %259 = vmatprep.subr.mxu1 %v190_v54  ;;  %438 = vmatprep.subr.mxu0 %v308_v32  ;;  %v288_v54 = vld [vmem:[%s688_s5] sm:$0xff]  ;;  %s504_s5 = smov [#allocation5]  }
  0x3e   :  { %260 = vmatpush2.msra.mxu1 %v189_v55  ;;  %439 = vmatpush3.msra.mxu0 %v292_v33  ;;  %v203_v55 = vld [vmem:[%s687_s4] sm:$0x3]  ;;  %s405_s16 = sshll.u32 %s504_s5, 4  ;;  %s406_s16 = int_to_ptr.vmem [resolvable:$true] %s405_s16 }
  0x3f   :  { %261 = vmatprep.subr.mxu1 %v188_v56  ;;  %440 = vmatprep.subr.mxu0 %v307_v47  ;;  %v208_v56 = vrot.slane %v203_v55, %v54_v36  ;;  %s476_s4 = scalar_lea.vmem %s406_s16, 128  ;;  %p481_p6 = scmp.lt.s32.totalorder %s406_s16, %s406_s16 }
  0x40   :  { %262 = vmatpush2.msra.mxu1 %v187_v57  ;;  %441 = vmatpush3.msra.mxu0 %v291_v48  ;;  %v212_v57 = vrot.slane %v203_v55, %v58_v38  ;;  %p477_p5 = scmp.ne.s32.totalorder %s406_s16, %s476_s4  ;;  %p482_p7 = scmp.lt.s32.totalorder %s476_s4, %s476_s4 }
  0x41   :  { %263 = vmatprep.subr.mxu1 %v186_v58  ;;  %442 = vmatprep.subr.mxu0 %v306_v49 }
  0x42   :  { %264 = vmatpush2.msra.mxu1 %v185_v59  ;;  %443 = vmatpush3.msra.mxu0 %v290_v50  ;;  %p483_p8 = por %p482_p7, %p481_p6 }
  0x43   :  { %265 = vmatprep.subr.mxu1 %v184_v60  ;;  %444 = vmatprep.subr.mxu0 %v305_v51 }
  0x44   :  { %266 = vmatpush2.msra.mxu1 %v183_v61  ;;  %445 = vmatpush3.msra.mxu0 %v289_v52  ;;  %p484_p9 = pnand %p483_p8, %p477_p5 }
  0x45   :  { %267 = vmatprep.subr.mxu1 %v182_v62  ;;  %446 = vmatprep.subr.mxu0 %v304_v53 }
  0x46   :  { %268 = vmatpush2.msra.mxu1 %v181_v63  ;;  %447 = vmatpush3.msra.mxu0 %v288_v54 }
  0x47   :  { %269 = vmatprep.subr.mxu1 %v180_v0 }
  0x48   :  { %270 = vmatpush2.msra.mxu1 %v179_v1  ;;  %v415_v1 = vld [vmem:[%s689_s6] ss:$0 sm:$0xff] }
  0x49   :  { %271 = vmatprep.subr.mxu1 %v178_v2 }
  0x4a   :  { %272 = vmatpush2.msra.mxu1 %v177_v3 }
  0x4b   :  { %273 = vmatprep.subr.mxu1 %v176_v4 }
  0x4c   :  { %274 = vmatpush2.msra.mxu1 %v175_v5 }
  0x4d   :  { %275 = vmatprep.subr.mxu1 %v174_v6 }
  0x4e   :  { %276 = vmatpush2.msra.mxu1 %v173_v7 }
  0x4f   :  { %277 = vmatprep.subr.mxu1 %v172_v8 }
  0x50   :  { %278 = vmatpush2.msra.mxu1 %v171_v9 }
  0xd7   :  { %v132_v41 = vpop.f32.mrf.mxu0 }
  0xd8   :  { %v133_v42 = vadd.f32 %v132_v41, %v55_v39 }
  0xd9   :  { %v134_v43 = vpop.f32.mrf.mxu0 }
  0xda   :  { %v135_v44 = vadd.f32 %v134_v43, %v59_v40  ;;  %v137_v46 = vmax.f32 %v133_v42, 0.0 }
  0xdc   :  { %v138_v45 = vmax.f32 %v135_v44, 0.0 }
  0xde   :  { %279 = vmatprep.mubr.f32.mxu1 %v138_v45 }
  0xdf   :  { %280 = vmatmul.mubr.f32.vlgmr.msra.gmra.mxu1 %v137_v46 }
 0x19f   :  { %v281_v58 = vpop.f32.mrf.mxu1 }
 0x1a0   :  { %v282_v59 = vadd.f32 %v281_v58, %v208_v56 }
 0x1a1   :  { %v283_v60 = vpop.f32.mrf.mxu1 }
 0x1a2   :  { %v284_v61 = vadd.f32 %v283_v60, %v212_v57  ;;  %v286_v63 = vmax.f32 %v282_v59, 0.0 }
 0x1a4   :  { %v287_v62 = vmax.f32 %v284_v61, 0.0 }
 0x1a6   :  { %391 = vmatprep.mubr.f32.mxu0 %v287_v62 }
 0x1a7   :  { %392 = vmatmul.mubr.f32.vlgmr.msra.gmra.mxu0 %v286_v63 }
 0x267   :  { %v448_v0 = vpop.f32.mrf.mxu0 }
 0x269   :  { %v449_v2 = vpop.f32.mrf.mxu0 }
 0x26a   :  { %v450_v3 = vadd.f32 %v449_v2, %v448_v0 }
 0x26c   :  { %v394_v4 = vadd.f32 %v450_v3, %v415_v1 }
 0x26e   :  { %398 = vst.msk [vmem:[#allocation5] sm:$0xff] %vm397_vm1, %v394_v4 }
 0x26f   :  { %487 = shalt.err (!%p484_p9)
}
 0x270   :  { %408 = dma.vmem_to_hbm [thread:$0]  %s406_s16, 128, %s690_s7, [#allocation4]  }
 0x271   :  { %498 = dma.done.wait [#allocation4], 128  }
 0x272   :  { %499 = vsyncadd [#allocation4], 4294967168 }
 0x273   :  { %412 = vsyncpa [#allocation3], 1 }
 0x274   :  { %413 = vsyncpa [#allocation4], 1 }

</bundles_post_ra>
